<compile_context>
chip_gen: v6e
topology: v6e:2x2x1
jax: 0.10.0
libtpu: 0.0.40
codegen_flags: <defaults>
</compile_context>

<pallas_src>
import functools

import jax
import jax.numpy as jnp
from jax.experimental import pallas as pl
from jax.experimental.pallas import tpu as pltpu


_MAX_TILE_M = 256  # rows per grid step; conservative for v7x's 64 MiB VMEM


def _round_up(n, m):
    return ((n + m - 1) // m) * m


def linear_kernel(x_ref, w_ref, b_ref, o_ref):
    # x_ref: (TILE_M, D_pad)   w_ref: (D_pad, C_pad)  (already transposed)
    # b_ref: (1, C_pad)        o_ref: (TILE_M, C_pad)
    acc = jnp.dot(
        x_ref[...],
        w_ref[...],
        preferred_element_type=jnp.float32,  # f32 accumulate on the MXU
    )
    # Single fused bias-add + cast epilogue (keeps the vst slot light on v5e).
    o_ref[...] = (acc + b_ref[...]).astype(o_ref.dtype)


def _linear_stage(h_pad, weight, bias, tile_m):
    """One pipeline stage: padded (M_pad, D_pad) @ W.T + b -> (M_pad, C_pad).

    `weight` is PyTorch-layout [C, D]; it is transposed and zero-padded ONCE
    here (wrapper side), not inside the kernel.
    """
    M_pad, D_pad = h_pad.shape
    C, D = weight.shape
    C_pad = _round_up(C, 128)

    # One-time layout change: W -> [D_pad, C_pad], zero-padded (lane-dense N).
    w_t = jnp.zeros((D_pad, C_pad), weight.dtype).at[:D, :C].set(weight.T)
    b2 = jnp.zeros((1, C_pad), bias.dtype).at[0, :C].set(bias)

    grid = (M_pad // tile_m,)
    out = pl.pallas_call(
        linear_kernel,
        out_shape=jax.ShapeDtypeStruct((M_pad, C_pad), h_pad.dtype),
        grid=grid,
        in_specs=[
            # x: tiled over M ("parallel" grid axis), double-buffered by default.
            pl.BlockSpec((tile_m, D_pad), lambda i: (i, 0),
                         memory_space=pltpu.MemorySpace.VMEM),
            # W and bias: full-block, VMEM-resident across all grid steps.
            pl.BlockSpec((D_pad, C_pad), lambda i: (0, 0),
                         memory_space=pltpu.MemorySpace.VMEM),
            pl.BlockSpec((1, C_pad), lambda i: (0, 0),
                         memory_space=pltpu.MemorySpace.VMEM),
        ],
        out_specs=pl.BlockSpec((tile_m, C_pad), lambda i: (i, 0),
                               memory_space=pltpu.MemorySpace.VMEM),
        compiler_params=pltpu.CompilerParams(
            dimension_semantics=("parallel",)),
        cost_estimate=pl.CostEstimate(
            flops=2 * M_pad * D_pad * C_pad,
            transcendentals=0,
            bytes_accessed=4 * (M_pad * D_pad + D_pad * C_pad + M_pad * C_pad),
        ),
    )(h_pad, w_t, b2)
    return out


def pipeline_forward(x, weights, biases, input_size):
    """ModelPipeline.forward: apply each (Linear) stage in sequence.

    weights[k]: [C_k, D_k] (PyTorch Linear layout), biases[k]: [C_k].
    """
    if len(weights) == 0:
        return x  # empty pipeline is the identity

    # First stage's .view(-1, input_size); later stages are already 2-D.
    h = x.reshape(-1, input_size)
    M, D = h.shape

    # M tile: sublane-aligned; tiled across a "parallel" grid when M is large.
    if M <= _MAX_TILE_M:
        tile_m = _round_up(M, 8)
        M_pad = tile_m
    else:
        tile_m = _MAX_TILE_M
        M_pad = _round_up(M, tile_m)

    D_pad = _round_up(D, 128)
    h_pad = jnp.zeros((M_pad, D_pad), h.dtype).at[:M, :D].set(h)

    # Chain stages on the padded activations (padded cols stay exactly zero).
    for w, b in zip(weights, biases):
        h_pad = _linear_stage(h_pad, w, b, tile_m)

    C_last = weights[-1].shape[0]
    return h_pad[:M, :C_last]


# TODO(synk): nn.ModuleList.add_model (runtime mutation of the model list) has
# no Pallas equivalent; the stage list is fixed at trace time.

if __name__ == "__main__":
    # Pipeline of two MLP Linear stages: 32 -> 64 -> 16.
    input_size = 32
    hidden_size = 64
    num_classes = 16

    key = jax.random.PRNGKey(0)
    kx, kw1, kb1, kw2, kb2 = jax.random.split(key, 5)

    # x: [2, 4, 8] -> view(-1, 32) => (2, 32)
    x = jax.random.normal(kx, (2, 4, 8), dtype=jnp.float32)

    def init_linear(kw, kb, fan_in, fan_out):
        # PyTorch Linear default init: U(-1/sqrt(fan_in), 1/sqrt(fan_in))
        bound = 1.0 / jnp.sqrt(jnp.float32(fan_in))
        w = jax.random.uniform(kw, (fan_out, fan_in), dtype=jnp.float32,
                               minval=-bound, maxval=bound)
        b = jax.random.uniform(kb, (fan_out,), dtype=jnp.float32,
                               minval=-bound, maxval=bound)
        return w, b

    w1, b1 = init_linear(kw1, kb1, input_size, hidden_size)
    w2, b2 = init_linear(kw2, kb2, hidden_size, num_classes)
    weights = (w1, w2)
    biases = (b1, b2)

    fwd = jax.jit(pipeline_forward, static_argnums=3)
    out = fwd(x, weights, biases, input_size)
    out = jax.block_until_ready(out)

    # Plain-JAX reference of the pipeline (f32 throughout).
    ref = x.reshape(-1, input_size)
    for w, b in zip(weights, biases):
        ref = ref @ w.T + b

    assert out.shape == (2, num_classes), out.shape
    assert jnp.allclose(out, ref, atol=1e-5, rtol=1e-5)
    print("KERNEL_OK")
</pallas_src>

<mosaic_0001>
module attributes {stable_mosaic.version = 11 : i64} {
  func.func @linear_kernel(%arg0: i32, %arg1: memref<8x128xf32, #tpu.memory_space<vmem>>, %arg2: memref<128x128xf32, #tpu.memory_space<vmem>>, %arg3: memref<1x128xf32, #tpu.memory_space<vmem>>, %arg4: memref<8x128xf32, #tpu.memory_space<vmem>>) attributes {dimension_semantics = [#tpu.dimension_semantics<parallel>], iteration_bounds = array<i64: 1>, scalar_prefetch = 0 : i64, scratch_operands = 0 : i64, tpu.core_type = #tpu.core_type<tc>, window_params = [{transform_indices = @transform_0, window_bounds = array<i64: 8, 128>}, {pipeline_mode = #tpu.pipeline_mode<synchronous>, transform_indices = @transform_1, window_bounds = array<i64: 128, 128>}, {pipeline_mode = #tpu.pipeline_mode<synchronous>, transform_indices = @transform_2, window_bounds = array<i64: 1, 128>}, {transform_indices = @transform_3, window_bounds = array<i64: 8, 128>}]} {
    %c0 = arith.constant 0 : index
    %c0_0 = arith.constant 0 : index
    %0 = vector.load %arg1[%c0, %c0_0] : memref<8x128xf32, #tpu.memory_space<vmem>>, vector<8x128xf32>
    %c0_1 = arith.constant 0 : index
    %c0_2 = arith.constant 0 : index
    %1 = vector.load %arg2[%c0_1, %c0_2] : memref<128x128xf32, #tpu.memory_space<vmem>>, vector<128x128xf32>
    %cst = arith.constant dense<0.000000e+00> : vector<8x128xf32>
    %2 = tpu.matmul %0, %1, %cst {dimension_numbers = #tpu.dot_dimension_numbers<[1], [0], [0], [1], [0, 0, 1, 1], [], []>} : vector<8x128xf32>, vector<128x128xf32>, vector<8x128xf32> -> vector<8x128xf32>
    %c0_3 = arith.constant 0 : index
    %c0_4 = arith.constant 0 : index
    %3 = vector.load %arg3[%c0_3, %c0_4] : memref<1x128xf32, #tpu.memory_space<vmem>>, vector<1x128xf32>
    %4 = vector.broadcast %3 : vector<1x128xf32> to vector<8x128xf32>
    %5 = arith.addf %2, %4 : vector<8x128xf32>
    %c0_5 = arith.constant 0 : index
    %c0_6 = arith.constant 0 : index
    %6 = vector.load %arg4[%c0_5, %c0_6] : memref<8x128xf32, #tpu.memory_space<vmem>>, vector<8x128xf32>
    tpu.vector_store %arg4[%c0_5, %c0_6], %5 {strides = array<i32>} : memref<8x128xf32, #tpu.memory_space<vmem>>, vector<8x128xf32>,
    return
  }
  func.func @transform_0(%arg0: i32) -> (i32, i32) {
    %c0_i32 = arith.constant 0 : i32
    %c0_i32_0 = arith.constant 0 : i32
    return %arg0, %c0_i32 : i32, i32
  }
  func.func @transform_1(%arg0: i32) -> (i32, i32) {
    %c0_i32 = arith.constant 0 : i32
    %c0_i32_0 = arith.constant 0 : i32
    %c0_i32_1 = arith.constant 0 : i32
    return %c0_i32, %c0_i32_0 : i32, i32
  }
  func.func @transform_2(%arg0: i32) -> (i32, i32) {
    %c0_i32 = arith.constant 0 : i32
    %c0_i32_0 = arith.constant 0 : i32
    %c0_i32_1 = arith.constant 0 : i32
    return %c0_i32, %c0_i32_0 : i32, i32
  }
  func.func @transform_3(%arg0: i32) -> (i32, i32) {
    %c0_i32 = arith.constant 0 : i32
    %c0_i32_0 = arith.constant 0 : i32
    return %arg0, %c0_i32 : i32, i32
  }
}

</mosaic_0001>

<bundles_post_ra>
// kernel: pipeline_forward.2
= control target key start
LH: loop header
LB: loop body
LE: loop exit
PB: predicated region body
PF: predicated region fallthrough
CT: control target
= control target key end

     0   :  { %v168_v0 = vmov 0.0   ;;  %vm169_vm0 = vmmov 0   ;;  %s247_s1 = inlined_call_operand.vmem [shape: f32[128,128], index: 1, kind: input, shape index: {}]   ;;  %s248_s0 = inlined_call_operand.vmem [shape: f32[8,128], index: 0, kind: input, shape index: {}]   ;;  %s249_s2 = inlined_call_operand.vmem [shape: f32[1,128], index: 2, kind: input, shape index: {}]   ;;  %s250_s3 = inlined_call_operand.vmem [shape: f32[8,128], index: 3, kind: output, shape index: {}]  }
   0x1   :  { %131 = vmatprep.subr.mxu0 %v168_v0  ;;  %v30_v1 = vld [vmem:[%s247_s1 + $0x78] sm:$0xff]  ;;  %v29_v2 = vld [vmem:[%s247_s1 + $0x70] sm:$0xff]  ;;  %163 = vmatprep.mubr.msk.f32.mxu0 %vm169_vm0, %v168_v0  ;;  %v28_v3 = vld [vmem:[%s247_s1 + $0x68] sm:$0xff] }
   0x2   :  { %132 = vmatpush3.msra.mxu0 %v30_v1  ;;  %v27_v4 = vld [vmem:[%s247_s1 + $0x60] sm:$0xff]  ;;  %v26_v5 = vld [vmem:[%s247_s1 + $0x58] sm:$0xff]  ;;  %v25_v6 = vld [vmem:[%s247_s1 + $0x50] sm:$0xff] }
   0x3   :  { %133 = vmatprep.subr.mxu0 %v168_v0  ;;  %v24_v7 = vld [vmem:[%s247_s1 + $0x48] sm:$0xff]  ;;  %v23_v8 = vld [vmem:[%s247_s1 + $0x40] sm:$0xff]  ;;  %v22_v9 = vld [vmem:[%s247_s1 + $0x38] sm:$0xff] }
   0x4   :  { %134 = vmatpush3.msra.mxu0 %v29_v2  ;;  %v21_v10 = vld [vmem:[%s247_s1 + $0x30] sm:$0xff]  ;;  %v20_v11 = vld [vmem:[%s247_s1 + $0x28] sm:$0xff]  ;;  %v19_v12 = vld [vmem:[%s247_s1 + $0x20] sm:$0xff] }
   0x5   :  { %135 = vmatprep.subr.mxu0 %v168_v0  ;;  %v18_v13 = vld [vmem:[%s247_s1 + $0x18] sm:$0xff]  ;;  %v17_v14 = vld [vmem:[%s247_s1 + $0x10] sm:$0xff]  ;;  %v16_v15 = vld [vmem:[%s247_s1 + $0x8] sm:$0xff] }
   0x6   :  { %136 = vmatpush3.msra.mxu0 %v28_v3  ;;  %v15_v16 = vld [vmem:[%s247_s1] sm:$0xff] }
   0x7   :  { %137 = vmatprep.subr.mxu0 %v168_v0  ;;  %v14_v17 = vld [vmem:[%s248_s0] sm:$0xff] }
   0x8   :  { %138 = vmatpush3.msra.mxu0 %v27_v4  ;;  %v113_v18 = vld [vmem:[%s249_s2] ss:$0 sm:$0xff] }
   0x9   :  { %139 = vmatprep.subr.mxu0 %v168_v0 }
   0xa   :  { %140 = vmatpush3.msra.mxu0 %v26_v5 }
   0xb   :  { %141 = vmatprep.subr.mxu0 %v168_v0 }
   0xc   :  { %142 = vmatpush3.msra.mxu0 %v25_v6 }
   0xd   :  { %143 = vmatprep.subr.mxu0 %v168_v0 }
   0xe   :  { %144 = vmatpush3.msra.mxu0 %v24_v7 }
   0xf   :  { %145 = vmatprep.subr.mxu0 %v168_v0 }
  0x10   :  { %146 = vmatpush3.msra.mxu0 %v23_v8 }
  0x11   :  { %147 = vmatprep.subr.mxu0 %v168_v0 }
  0x12   :  { %148 = vmatpush3.msra.mxu0 %v22_v9 }
  0x13   :  { %149 = vmatprep.subr.mxu0 %v168_v0 }
  0x14   :  { %150 = vmatpush3.msra.mxu0 %v21_v10 }
  0x15   :  { %151 = vmatprep.subr.mxu0 %v168_v0 }
  0x16   :  { %152 = vmatpush3.msra.mxu0 %v20_v11 }
  0x17   :  { %153 = vmatprep.subr.mxu0 %v168_v0 }
  0x18   :  { %154 = vmatpush3.msra.mxu0 %v19_v12 }
  0x19   :  { %155 = vmatprep.subr.mxu0 %v168_v0 }
  0x1a   :  { %156 = vmatpush3.msra.mxu0 %v18_v13 }
  0x1b   :  { %157 = vmatprep.subr.mxu0 %v168_v0 }
  0x1c   :  { %158 = vmatpush3.msra.mxu0 %v17_v14 }
  0x1d   :  { %159 = vmatprep.subr.mxu0 %v168_v0 }
  0x1e   :  { %160 = vmatpush3.msra.mxu0 %v16_v15 }
  0x1f   :  { %161 = vmatprep.subr.mxu0 %v168_v0 }
  0x20   :  { %162 = vmatpush3.msra.mxu0 %v15_v16 }
  0x21   :  { %164 = vmatmul.mubr.f32.vlgmr.msra.gmra.mxu0 %v14_v17 }
  0xe1   :  { %v104_v19 = vpop.f32.mrf.mxu0 }
  0xe2   :  { %v105_v20 = vadd.f32 %v113_v18, %v104_v19 }
  0xe3   :  { %v165_v21 = vpop.f32.mrf.mxu0 }
  0xe4   :  { %108 = vst [vmem:[%s250_s3] sm:$0xff] %v105_v20 }

</bundles_post_ra>
